<compile_context>
chip_gen: v7x
topology: tpu7x:2x2x1
jax: 0.10.0
libtpu: 0.0.40
codegen_flags: <defaults>
</compile_context>

<pallas_src>
import functools

import jax
import jax.numpy as jnp
from jax.experimental import pallas as pl
from jax.experimental.pallas import tpu as pltpu


# --------------------------------------------------------------------------- helpers
def _dtype_granule(dtype):
    """Sublane granule for a dtype: 8 for 32-bit, 16 for 16-bit, 32 for 8-bit."""
    bits = jnp.dtype(dtype).itemsize * 8
    if bits >= 32:
        return 8
    if bits == 16:
        return 16
    return 32


def _vmem_capacity_bytes():
    try:
        return int(pltpu.get_tpu_info().vmem_capacity_bytes)
    except Exception:
        return 64 * 1024 * 1024   # conservative fallback (v7x physical VMEM per TC)


def _single_buffer_supported():
    try:
        pl.BlockSpec((8, 128), lambda i: (0, 0), pipeline_mode=pl.Buffered(1))
        return True
    except Exception:
        return False


_SINGLE_BUFFER = _single_buffer_supported()


def _resident_spec(block_shape, index_map):
    """BlockSpec for an operand with a constant index_map: single-buffer it when the
    installed Pallas supports pipeline_mode (halves its VMEM footprint on v7x)."""
    if _SINGLE_BUFFER:
        return pl.BlockSpec(block_shape, index_map, pipeline_mode=pl.Buffered(1))
    return pl.BlockSpec(block_shape, index_map)


def _pick_tile(dim, cap, granule):
    """Largest divisor of `dim` that is <= cap and a multiple of `granule`.
    Returns `dim` itself if dim <= cap or no such divisor exists."""
    cap = min(dim, max(1, cap))
    if dim <= cap:
        return dim
    start = (cap // granule) * granule
    for t in range(start, 0, -granule):
        if dim % t == 0:
            return t
    # TODO(synk): no granule-multiple divisor <= cap (e.g. prime dim); fall back to the
    # full dimension (legal block, may be large) rather than an illegal sub-granule one.
    return dim


def _derive_reduce_tiles(B, S, H, E_pad, in_itemsize, w_itemsize, granule):
    """Budget-driven (tb, ts): cap tb (DMA contiguity comes from ts*H, not tb, and two
    batch tiles feed both v7x TensorCores), then maximise ts within the VMEM budget,
    shrinking tb further if even one sequence granule per input buffer would not fit."""
    budget = int(_vmem_capacity_bytes() * 0.6)       # headroom for compiler scratch
    w_bufs = 1 if _SINGLE_BUFFER else 2
    w_bytes = w_bufs * (H * E_pad + E_pad) * w_itemsize

    tb_cap = B if B < 2 * granule else min(64, B // 2)
    tb = _pick_tile(B, tb_cap, granule)

    def per_buffer_ts_cap(tb_):
        fixed = w_bytes + tb_ * H * 4 + 2 * tb_ * E_pad * in_itemsize
        avail = budget - fixed
        return avail // (2 * tb_ * H * in_itemsize)

    while per_buffer_ts_cap(tb) < granule and tb > granule:
        smaller = _pick_tile(B, tb // 2, granule)
        if smaller >= tb:
            break
        tb = smaller

    ts = _pick_tile(S, max(per_buffer_ts_cap(tb), granule), granule)
    return tb, ts


# --------------------------------------------------------------------------- kernels
def _cls_kernel(h_ref, w_ref, b_ref, o_ref, *, normalize):
    token = h_ref[...]                                           # (tb, H), native dtype
    out = jnp.dot(token, w_ref[...], preferred_element_type=jnp.float32)   # (tb, E_pad)
    out = out + b_ref[...].astype(jnp.float32)                   # broadcast (1, E_pad)
    out = jnp.tanh(out)
    if normalize:
        # matches torch.nn.functional.normalize(p=2, dim=1, eps=1e-12)
        norm = jnp.sqrt(jnp.sum(out * out, axis=-1, keepdims=True))
        out = out / jnp.maximum(norm, 1e-12)
    o_ref[...] = out.astype(o_ref.dtype)


def _reduce_kernel(h_ref, w_ref, b_ref, o_ref, acc_ref, *, mode, normalize, seq_len):
    # grid = (batch tiles, sequence tiles); acc_ref: (tb, H) f32 resident accumulator.
    s = pl.program_id(1)

    @pl.when(s == 0)
    def _init():
        if mode == "max":
            acc_ref[...] = jnp.full_like(acc_ref, -jnp.inf)
        else:
            acc_ref[...] = jnp.zeros_like(acc_ref)

    h = h_ref[...]                                               # (tb, ts, H), native dtype
    if mode == "max":
        acc_ref[...] = jnp.maximum(acc_ref[...],
                                   jnp.max(h, axis=1).astype(jnp.float32))
    else:  # mean / sum: accumulate in f32 without an f32 copy of the whole tile
        acc_ref[...] = acc_ref[...] + jnp.sum(h, axis=1, dtype=jnp.float32)

    @pl.when(s == pl.num_programs(1) - 1)
    def _finalize():
        token = acc_ref[...]                                     # (tb, H) f32
        if mode == "mean":
            token = token * (1.0 / float(seq_len))
        # Full-precision finalize: promote the weight to f32 so the pooled f32
        # accumulator is never re-quantized.  This matmul runs once per batch tile,
        # so the extra MXU passes are noise in this HBM-bound kernel.
        out = jnp.dot(token, w_ref[...].astype(jnp.float32),
                      preferred_element_type=jnp.float32)        # (tb, E_pad)
        out = out + b_ref[...].astype(jnp.float32)
        out = jnp.tanh(out)
        if normalize:
            norm = jnp.sqrt(jnp.sum(out * out, axis=-1, keepdims=True))
            out = out / jnp.maximum(norm, 1e-12)
        o_ref[...] = out.astype(o_ref.dtype)


# --------------------------------------------------------------------------- wrapper
def seq_pooler(hidden_states, weight_t, bias, *, mode="CLS", normalize=False,
               block_b=None, block_s=None, vmem_limit_bytes=None):
    """Pallas SeqPooler forward.

    hidden_states: (B, S, H); weight_t: (H, E) = torch_weight.T; bias: (E,).
    """
    assert mode in ("CLS", "mean", "max", "sum"), f"unknown mode: {mode}"
    B, S, H = hidden_states.shape
    assert weight_t.shape[0] == H, (
        "weight must be passed pre-transposed as (hidden_size, embed_size)")
    E = weight_t.shape[1]
    out_dtype = hidden_states.dtype
    in_itemsize = jnp.dtype(hidden_states.dtype).itemsize
    w_itemsize = jnp.dtype(weight_t.dtype).itemsize
    g = _dtype_granule(hidden_states.dtype)

    # Lane-dense output / full MXU columns: pad E up to a multiple of 128 with zero
    # weight & bias columns (tanh(0)=0 so the L2 norm is unchanged); slice afterwards.
    E_pad = E if E % 128 == 0 else ((E + 127) // 128) * 128
    if E_pad != E:
        weight_t = jnp.pad(weight_t, ((0, 0), (0, E_pad - E)))
        bias = jnp.pad(bias, (0, E_pad - E))
    bias2d = bias.reshape(1, E_pad)

    if vmem_limit_bytes is None:
        vmem_limit_bytes = int(_vmem_capacity_bytes() * 0.85)
    cp_kwargs = dict(vmem_limit_bytes=vmem_limit_bytes)

    if mode == "CLS":
        tb = block_b if block_b is not None else _pick_tile(
            B, B if B < 2 * g else min(128, B // 2), g)
        assert B % tb == 0, "block_b must divide the batch size"
        n_b = B // tb

        if H % 128 == 0 or S == 1:
            # Free row-major reshape: a (tb, H) block at column-block 0 is exactly the
            # first token of each row -> only B*H*itemsize bytes are read from HBM.
            first_tok_src = hidden_states.reshape(B, S * H)
        else:
            # H not lane-aligned: XLA slice before the kernel (still only B*H bytes in).
            first_tok_src = hidden_states[:, 0, :]

        kernel = functools.partial(_cls_kernel, normalize=normalize)
        out = pl.pallas_call(
            kernel,
            out_shape=jax.ShapeDtypeStruct((B, E_pad), out_dtype),
            grid_spec=pltpu.PrefetchScalarGridSpec(
                num_scalar_prefetch=0,
                grid=(n_b,),
                in_specs=[
                    pl.BlockSpec((tb, H), lambda b: (b, 0)),
                    _resident_spec((H, E_pad), lambda b: (0, 0)),   # weight stays resident
                    _resident_spec((1, E_pad), lambda b: (0, 0)),
                ],
                out_specs=pl.BlockSpec((tb, E_pad), lambda b: (b, 0)),
            ),
            compiler_params=pltpu.CompilerParams(
                dimension_semantics=("parallel",), **cp_kwargs),
        )(first_tok_src, weight_t, bias2d)
        return out[:, :E] if E_pad != E else out

    # mean / max / sum: pipeline the sequence reduction over a (B-tiles, S-tiles) grid.
    tb_auto, ts_auto = _derive_reduce_tiles(B, S, H, E_pad, in_itemsize, w_itemsize, g)
    tb = block_b if block_b is not None else tb_auto
    ts = block_s if block_s is not None else ts_auto
    assert B % tb == 0, "block_b must divide the batch size"
    assert S % ts == 0, "block_s must divide the sequence length"
    n_b, n_s = B // tb, S // ts

    kernel = functools.partial(_reduce_kernel, mode=mode, normalize=normalize,
                               seq_len=S)
    out = pl.pallas_call(
        kernel,
        out_shape=jax.ShapeDtypeStruct((B, E_pad), out_dtype),
        grid_spec=pltpu.PrefetchScalarGridSpec(
            num_scalar_prefetch=0,
            grid=(n_b, n_s),
            in_specs=[
                pl.BlockSpec((tb, ts, H), lambda b, s: (b, s, 0)),
                _resident_spec((H, E_pad), lambda b, s: (0, 0)),    # constant -> no re-DMA
                _resident_spec((1, E_pad), lambda b, s: (0, 0)),
            ],
            out_specs=pl.BlockSpec((tb, E_pad), lambda b, s: (b, 0)),
            scratch_shapes=[pltpu.VMEM((tb, H), jnp.float32)],
        ),
        compiler_params=pltpu.CompilerParams(
            dimension_semantics=("parallel", "arbitrary"), **cp_kwargs),
    )(hidden_states, weight_t, bias2d)
    return out[:, :E] if E_pad != E else out


# --------------------------------------------------------------------------- reference
def _reference(hidden_states, weight_t, bias, mode, normalize):
    h = hidden_states.astype(jnp.float32)
    if mode == "CLS":
        tok = h[:, 0, :]
    elif mode == "mean":
        tok = jnp.sum(h, axis=1) / h.shape[1]
    elif mode == "max":
        tok = jnp.max(h, axis=1)
    else:  # sum
        tok = jnp.sum(h, axis=1)
    out = jnp.tanh(tok @ weight_t.astype(jnp.float32) + bias.astype(jnp.float32))
    if normalize:
        n = jnp.sqrt(jnp.sum(out * out, axis=-1, keepdims=True))
        out = out / jnp.maximum(n, 1e-12)
    return out.astype(hidden_states.dtype)


if __name__ == "__main__":
    root = jax.random.PRNGKey(0)
    ok = True

    # (B, S, H, E, block_s, tolerance)
    cases = [
        (2, 8, 32, 32, None, 1e-5),      # tiny module-sized shapes; single grid step,
                                         # exercises E-padding and the CLS slice fallback
        (8, 64, 128, 128, 16, 2e-3),     # 4-step pipelined S reduction; CLS reshape path
    ]

    for idx, (B, S, H, E, block_s, tol) in enumerate(cases):
        k_h, k_w, k_b = jax.random.split(jax.random.fold_in(root, idx), 3)
        hidden_states = jax.random.normal(k_h, (B, S, H), dtype=jnp.float32)
        # torch Linear has weight (E, H), bias (E,)
        torch_weight = jax.random.uniform(k_w, (E, H), dtype=jnp.float32,
                                          minval=-0.1, maxval=0.1)
        bias = jax.random.uniform(k_b, (E,), dtype=jnp.float32,
                                  minval=-0.1, maxval=0.1)
        weight_t = torch_weight.T                                # (H, E) kernel layout

        for mode in ("CLS", "mean", "max", "sum"):
            for normalize in (False, True):
                got = seq_pooler(hidden_states, weight_t, bias,
                                 mode=mode, normalize=normalize, block_s=block_s)
                got = jax.block_until_ready(got)
                want = _reference(hidden_states, weight_t, bias, mode, normalize)
                if not jnp.allclose(got, want, atol=tol, rtol=tol):
                    ok = False

    if ok:
        print("KERNEL_OK")
    else:
        print("KERNEL_MISMATCH")
</pallas_src>

<mosaic_0001>
module attributes {stable_mosaic.version = 11 : i64} {
  func.func @_cls_kernel(%arg0: i32, %arg1: memref<2x32xf32, #tpu.memory_space<vmem>>, %arg2: memref<32x128xf32, #tpu.memory_space<vmem>>, %arg3: memref<1x128xf32, #tpu.memory_space<vmem>>, %arg4: memref<2x128xf32, #tpu.memory_space<vmem>>) attributes {dimension_semantics = [#tpu.dimension_semantics<parallel>], iteration_bounds = array<i64: 1>, scalar_prefetch = 0 : i64, scratch_operands = 0 : i64, tpu.core_type = #tpu.core_type<tc>, window_params = [{transform_indices = @transform_0, window_bounds = array<i64: 2, 32>}, {pipeline_mode = #tpu.pipeline_mode<synchronous>, transform_indices = @transform_1, window_bounds = array<i64: 32, 128>}, {pipeline_mode = #tpu.pipeline_mode<synchronous>, transform_indices = @transform_2, window_bounds = array<i64: 1, 128>}, {transform_indices = @transform_3, window_bounds = array<i64: 2, 128>}]} {
    %c0 = arith.constant 0 : index
    %c0_0 = arith.constant 0 : index
    %0 = vector.load %arg1[%c0, %c0_0] : memref<2x32xf32, #tpu.memory_space<vmem>>, vector<2x32xf32>
    %c0_1 = arith.constant 0 : index
    %c0_2 = arith.constant 0 : index
    %1 = vector.load %arg2[%c0_1, %c0_2] : memref<32x128xf32, #tpu.memory_space<vmem>>, vector<32x128xf32>
    %cst = arith.constant dense<0.000000e+00> : vector<2x128xf32>
    %2 = tpu.matmul %0, %1, %cst {dimension_numbers = #tpu.dot_dimension_numbers<[1], [0], [0], [1], [0, 0, 1, 1], [], []>} : vector<2x32xf32>, vector<32x128xf32>, vector<2x128xf32> -> vector<2x128xf32>
    %c0_3 = arith.constant 0 : index
    %c0_4 = arith.constant 0 : index
    %3 = vector.load %arg3[%c0_3, %c0_4] : memref<1x128xf32, #tpu.memory_space<vmem>>, vector<1x128xf32>
    %4 = vector.broadcast %3 : vector<1x128xf32> to vector<2x128xf32>
    %5 = arith.addf %2, %4 : vector<2x128xf32>
    %6 = math.tanh %5 : vector<2x128xf32>
    %c0_5 = arith.constant 0 : index
    %c0_6 = arith.constant 0 : index
    %7 = vector.load %arg4[%c0_5, %c0_6] : memref<2x128xf32, #tpu.memory_space<vmem>>, vector<2x128xf32>
    tpu.vector_store %arg4[%c0_5, %c0_6], %6 {strides = array<i32>} : memref<2x128xf32, #tpu.memory_space<vmem>>, vector<2x128xf32>,
    return
  }
  func.func @transform_0(%arg0: i32) -> (i32, i32) {
    %c0_i32 = arith.constant 0 : i32
    %c0_i32_0 = arith.constant 0 : i32
    return %arg0, %c0_i32 : i32, i32
  }
  func.func @transform_1(%arg0: i32) -> (i32, i32) {
    %c0_i32 = arith.constant 0 : i32
    %c0_i32_0 = arith.constant 0 : i32
    %c0_i32_1 = arith.constant 0 : i32
    return %c0_i32, %c0_i32_0 : i32, i32
  }
  func.func @transform_2(%arg0: i32) -> (i32, i32) {
    %c0_i32 = arith.constant 0 : i32
    %c0_i32_0 = arith.constant 0 : i32
    %c0_i32_1 = arith.constant 0 : i32
    return %c0_i32, %c0_i32_0 : i32, i32
  }
  func.func @transform_3(%arg0: i32) -> (i32, i32) {
    %c0_i32 = arith.constant 0 : i32
    %c0_i32_0 = arith.constant 0 : i32
    return %arg0, %c0_i32 : i32, i32
  }
}

</mosaic_0001>

<bundles_post_ra>
// kernel: tpu_custom_call.1
= control target key start
LH: loop header
LB: loop body
LE: loop exit
PB: predicated region body
PF: predicated region fallthrough
CT: control target
= control target key end

     0   :  { %8 = vsyncpa [#allocation3], 0  ;;  %s325_s0 = inlined_call_operand.hbm [shape: f32[2,32], index: 0, kind: input, shape index: {}]   ;;  %s326_s1 = inlined_call_operand.hbm [shape: f32[32,128], index: 1, kind: input, shape index: {}]   ;;  %s327_s2 = inlined_call_operand.vmem [shape: f32[1,128], index: 2, kind: input, shape index: {}]   ;;  %s328_s3 = inlined_call_operand.hbm [shape: f32[2,128], index: 3, kind: output, shape index: {}]  }
   0x1   :  { %9 = vsyncpa [#allocation6], 0 }
   0x2   :  { %10 = vsyncpa [#allocation4], 0  ;;  %s251_s12 = smov [#allocation2]   ;;  %s252_s14 = smov [#allocation5]  }
   0x3   :  { %s17_s13 = sshll.u32 %s251_s12, 4  ;;  %s26_s15 = sshll.u32 %s252_s14, 4  ;;  %s18_s13 = int_to_ptr.vmem [resolvable:$true] %s17_s13  ;;  %s279_s15 = int_to_ptr.vmem [resolvable:$true] %s26_s15 }
   0x4   :  { %s179_s18 = scalar_lea.hbm %s325_s0, 32 }
   0x5   :  { %p180_p0 = scmp.ne.s32.totalorder %s325_s0, %s179_s18  ;;  %p183_p1 = scmp.lt.u32.totalorder %s179_s18, %s325_s0 }
   0x7   :  { %p185_p2 = pnand %p183_p1, %p180_p0 }
   0x9   :  { %188 = shalt.err (!%p185_p2)
}
   0xa   :  { %s189_s23 = scalar_lea.vmem %s18_s13, 32  ;;  %p194_p4 = scmp.lt.s32.totalorder %s18_s13, %s18_s13 }
   0xb   :  { %p190_p3 = scmp.ne.s32.totalorder %s18_s13, %s189_s23  ;;  %p195_p5 = scmp.lt.s32.totalorder %s189_s23, %s189_s23 }
   0xd   :  { %p196_p6 = por %p195_p5, %p194_p4 }
   0xf   :  { %p197_p7 = pnand %p196_p6, %p190_p3 }
  0x11   :  { %200 = shalt.err (!%p197_p7)
}
  0x12   :  { %20 = dma.hbm_to_vmem [thread:$0]  %s325_s0, 32, %s18_s13, [#allocation3]  }
  0x13   :  { %s201_s28 = scalar_lea.hbm %s326_s1, 512 }
  0x14   :  { %p202_p8 = scmp.ne.s32.totalorder %s326_s1, %s201_s28  ;;  %p205_p9 = scmp.lt.u32.totalorder %s201_s28, %s326_s1 }
  0x16   :  { %p207_p10 = pnand %p205_p9, %p202_p8 }
  0x18   :  { %210 = shalt.err (!%p207_p10)
}
  0x19   :  { %s211_s6 = scalar_lea.vmem %s279_s15, 512  ;;  %p216_p12 = scmp.lt.s32.totalorder %s279_s15, %s279_s15 }
  0x1a   :  { %p212_p11 = scmp.ne.s32.totalorder %s279_s15, %s211_s6  ;;  %p217_p13 = scmp.lt.s32.totalorder %s211_s6, %s211_s6 }
  0x1c   :  { %p218_p0 = por %p217_p13, %p216_p12 }
  0x1e   :  { %p219_p1 = pnand %p218_p0, %p212_p11 }
  0x20   :  { %222 = shalt.err (!%p219_p1)
}
  0x21   :  { %s253_s0 = smov 128   ;;  %s254_s7 = smov 8  }
  0x22   :  { %32 = dma.hbm_to_vmem [thread:$0]  %s326_s1, 512, %s279_s15, [#allocation6], %s253_s0, %s253_s0, %s254_s7  }
  0x23   :  { %245 = dma.done.wait [#allocation3], 32  }
  0x24   :  { %246 = vsyncadd [#allocation3], 4294967264 }
  0x25   :  { %247 = dma.done.wait [#allocation6], 512  }
  0x26   :  { %248 = vsyncadd [#allocation6], 4294966784  ;;  %v255_v0 = vmov 0.0|0.0   ;;  %vm256_vm0 = vmmov 0   ;;  %v257_v1 = vmov 0.0   ;;  %v42_v2 = vld [vmem:[#allocation5] sm:$0xff] }
  0x27   :  { %163 = vmatprep.subr.bf16.mxu0 %v255_v0  ;;  %160 = vmatprep.mubr.msk.f32.mxu0 %vm256_vm0, %v257_v1  ;;  %v43_v3 = vld [vmem:[#allocation5 + $0x8] sm:$0xff]  ;;  %v44_v4 = vld [vmem:[#allocation5 + $0x10] sm:$0xff]  ;;  %v45_v6 = vld [vmem:[#allocation5 + $0x18] sm:$0xff]  ;;  %vm53_vm1 = vcmask 261120   ;;  %s258_s11 = smov [#allocation7]  }
  0x28   :  { %v164_v5 = vpack.c.bf16 %v43_v3, %v42_v2  ;;  %v167_v7 = vpack.c.bf16 %v45_v6, %v44_v4  ;;  %v41_v8 = vld [vmem:[#allocation2] sm:$0x3]  ;;  %s135_s12 = sshll.u32 %s258_s11, 4  ;;  %s136_s12 = int_to_ptr.vmem [resolvable:$true] %s135_s12 }
  0x29   :  { %v145_v9 = vld [vmem:[%s327_s2] ss:$0 sm:$0xff]  ;;  %s223_s13 = scalar_lea.vmem %s136_s12, 32  ;;  %p228_p3 = scmp.lt.s32.totalorder %s136_s12, %s136_s12 }
  0x2a   :  { %165 = vmatpush3.bf16.msra.mxu0 %v164_v5  ;;  %p224_p2 = scmp.ne.s32.totalorder %s136_s12, %s223_s13  ;;  %p229_p4 = scmp.lt.s32.totalorder %s223_s13, %s223_s13 }
  0x2b   :  { %166 = vmatprep.subr.bf16.mxu0 %v255_v0 }
  0x2c   :  { %p230_p5 = por %p229_p4, %p228_p3 }
  0x2e   :  { %168 = vmatpush3.bf16.msra.mxu0 %v167_v7  ;;  %p231_p6 = pnand %p230_p5, %p224_p2 }
  0x31   :  { %161 = vmatmul.mubr.msk.f32.vlgmr.msra.gmra.mrb[0].mxu0 %vm53_vm1, %v41_v8 }
 0x104   :  { %v123_v10 = vpop.f32.mrb[0].mxu0 }
 0x105   :  { %v124_v11 = vadd.f32 %v145_v9, %v123_v10  ;;  %v162_v12 = vpop.f32.mrb[1].mxu0 }
 0x107   :  { %177 = vtanh.f32 %v124_v11 }
 0x111   :  { %v178_v13 = vpop.eup %177 }
 0x112   :  { %128 = vst [vmem:[#allocation7] sm:$0x3] %v178_v13 }
 0x113   :  { %234 = shalt.err (!%p231_p6)
}
 0x114   :  { %s235_s2 = scalar_lea.hbm %s328_s3, 32 }
 0x115   :  { %p236_p7 = scmp.ne.s32.totalorder %s328_s3, %s235_s2  ;;  %p239_p8 = scmp.lt.u32.totalorder %s235_s2, %s328_s3 }
 0x117   :  { %p241_p9 = pnand %p239_p8, %p236_p7 }
 0x119   :  { %244 = shalt.err (!%p241_p9)
}
 0x11a   :  { %138 = dma.vmem_to_hbm [thread:$0]  %s136_s12, 32, %s328_s3, [#allocation4]  }
 0x11b   :  { %249 = dma.done.wait [#allocation4], 32  }
 0x11c   :  { %250 = vsyncadd [#allocation4], 4294967264 }
 0x11d   :  { %142 = vsyncpa [#allocation3], 1 }
 0x11e   :  { %143 = vsyncpa [#allocation6], 1 }
 0x11f   :  { %144 = vsyncpa [#allocation4], 1 }

</bundles_post_ra>
